<compile_context>
chip_gen: v7x
topology: tpu7x:2x2x1
jax: 0.10.0
libtpu: 0.0.40
codegen_flags: <defaults>
</compile_context>

<pallas_src>
import jax
import jax.numpy as jnp
from jax.experimental import pallas as pl
from jax.experimental.pallas import tpu as pltpu

HIDDEN = [512, 256, 128, 64, 32, 16, 8]   # DNN2 hidden widths
PAD = 128                                 # uniform padded width for tail layers / output
MISC_LANES = 512                          # lane width of the packed bias/W0 slab
N_LAYERS = len(HIDDEN) + 1                # 8 linear layers total
TILE_B_MAX = 256                          # batch tile (rows per grid step) at large batch


def _round_up(x, m):
    return ((x + m - 1) // m) * m


def _mlp_kernel(x_ref, w1_ref, wt_ref, misc_ref, o_ref):
    """One batch tile: full MLP forward, all weights resident in VMEM across steps.

    x_ref   : [tile_b, in_dim]   bf16
    w1_ref  : [512, 256]         bf16   (layer 1 weight)
    wt_ref  : [7, 128, 128]      bf16   (W2 split in 2 K-blocks + 5 zero-padded tails)
    misc_ref: [12, 512]          f32    (rows 0..7 biases, rows 8..11 = W0 [4,512])
    o_ref   : [tile_b, 128]      f32    (lane-dense, zero-padded logits)
    """
    bf16, f32 = jnp.bfloat16, jnp.float32

    b = misc_ref                                   # bias rows, f32
    w0 = misc_ref[8:12, :].astype(bf16)            # [4, 512], tiny one-off cast

    # layer 0: in_dim -> 512
    h = jnp.dot(x_ref[...], w0, preferred_element_type=f32) + b[0:1, :]
    h = jnp.maximum(h, 0.0)                        # [tb, 512] f32

    # layer 1: 512 -> 256
    h = jnp.dot(h.astype(bf16), w1_ref[...], preferred_element_type=f32) + b[1:2, 0:256]
    h = jnp.maximum(h, 0.0)                        # [tb, 256] f32

    # layer 2: 256 -> 128, 2-step K accumulation over the two [128,128] blocks
    z = jnp.dot(h[:, 0:128].astype(bf16), wt_ref[0], preferred_element_type=f32)
    z = z + jnp.dot(h[:, 128:256].astype(bf16), wt_ref[1], preferred_element_type=f32)
    h = jnp.maximum(z + b[2:3, 0:PAD], 0.0)        # [tb, 128] f32

    # layers 3..7: zero-padded 128x128 tails (128->64->32->16->8->out); last has no ReLU.
    # Zero-padded weight rows/cols + zero-padded bias lanes keep padded lanes exactly 0.
    for t in range(5):
        z = jnp.dot(h.astype(bf16), wt_ref[2 + t],
                    preferred_element_type=f32) + b[3 + t:4 + t, 0:PAD]
        h = jnp.maximum(z, 0.0) if t != 4 else z

    o_ref[...] = h.astype(o_ref.dtype)             # lane-dense padded logits


def pack_params(weights, biases):
    """weights[i]: [in_i, out_i] f32, biases[i]: [out_i] f32 -> 3 packed kernel operands."""
    assert len(weights) == N_LAYERS and len(biases) == N_LAYERS
    # Layer-1 weight stays its own bf16 operand (512x256, the biggest matrix).
    w1 = weights[1].astype(jnp.bfloat16)

    # Tail stack: W2 split into two exact [128,128] K-blocks + 5 zero-padded tails.
    blocks = [weights[2][0:PAD, :], weights[2][PAD:2 * PAD, :]]
    for w in weights[3:]:
        wp = jnp.zeros((PAD, PAD), jnp.float32).at[: w.shape[0], : w.shape[1]].set(w)
        blocks.append(wp)
    w_tail = jnp.stack([blk.astype(jnp.bfloat16) for blk in blocks], axis=0)  # [7,128,128]

    # Misc slab: all 8 biases (lane-padded) + W0 rows, one f32 DMA.
    misc = jnp.zeros((N_LAYERS + weights[0].shape[0], MISC_LANES), jnp.float32)
    for i, bias in enumerate(biases):
        misc = misc.at[i, : bias.shape[-1]].set(bias)
    misc = misc.at[N_LAYERS:, : weights[0].shape[1]].set(weights[0])          # [4,512]
    return w1, w_tail, misc


def dnn2_forward(x, w1, w_tail, misc, out_dim):
    batch, in_dim = x.shape
    tile_b = min(TILE_B_MAX, _round_up(batch, 16))        # multiple of 16 (bf16 sublanes)
    b_pad = _round_up(batch, tile_b)

    x_bf16 = x.astype(jnp.bfloat16)                        # host-side cast: no in-kernel pack
    if b_pad != batch:
        x_bf16 = jnp.pad(x_bf16, ((0, b_pad - batch), (0, 0)))

    out_padded = pl.pallas_call(
        _mlp_kernel,
        grid=(b_pad // tile_b,),
        in_specs=[
            pl.BlockSpec((tile_b, in_dim), lambda i: (i, 0)),          # x: batch-tiled
            pl.BlockSpec((512, 256), lambda i: (0, 0)),                # W1: VMEM-resident
            pl.BlockSpec((7, PAD, PAD), lambda i: (0, 0, 0)),          # tails: resident
            pl.BlockSpec((misc.shape[0], MISC_LANES), lambda i: (0, 0)),  # biases+W0
        ],
        out_specs=pl.BlockSpec((tile_b, PAD), lambda i: (i, 0)),       # lane-dense output
        out_shape=jax.ShapeDtypeStruct((b_pad, PAD), jnp.float32),
        compiler_params=pltpu.CompilerParams(
            dimension_semantics=("parallel",),                         # v7x: 2 TCs at big B
        ),
    )(x_bf16, w1, w_tail, misc)

    return out_padded[:batch, :out_dim]                    # un-pad in XLA, not in-kernel


def init_params(key, input_dim, output_dim):
    """Deterministic init matching torch.nn.Linear's U(-1/sqrt(fan_in), 1/sqrt(fan_in))."""
    dims = [input_dim] + HIDDEN + [output_dim]
    weights, biases = [], []
    for i in range(len(dims) - 1):
        fan_in, fan_out = dims[i], dims[i + 1]
        key, kw, kb = jax.random.split(key, 3)
        bound = 1.0 / jnp.sqrt(jnp.float32(fan_in))
        # stored as [in, out] (transposed relative to PyTorch's [out, in])
        weights.append(jax.random.uniform(kw, (fan_in, fan_out), jnp.float32, -bound, bound))
        biases.append(jax.random.uniform(kb, (fan_out,), jnp.float32, -bound, bound))
    return weights, biases


def reference_forward(x, weights, biases):
    """Mirrors the kernel math: bf16 matmul operands, f32 accumulation, f32 bias/ReLU."""
    h = x
    n = len(weights)
    for i, (w, b) in enumerate(zip(weights, biases)):
        h = jnp.dot(h.astype(jnp.bfloat16), w.astype(jnp.bfloat16),
                    preferred_element_type=jnp.float32) + b
        if i != n - 1:
            h = jnp.maximum(h, 0.0)
    return h


if __name__ == "__main__":
    INPUT_DIM = 4    # iris features
    OUTPUT_DIM = 3   # setosa / versicolor / virginica
    BATCH = 8

    key = jax.random.PRNGKey(0)
    key, kx = jax.random.split(key)
    x = jax.random.normal(kx, (BATCH, INPUT_DIM), jnp.float32)

    weights, biases = init_params(key, INPUT_DIM, OUTPUT_DIM)
    w1, w_tail, misc = pack_params(weights, biases)

    out = dnn2_forward(x, w1, w_tail, misc, OUTPUT_DIM)
    out = jax.block_until_ready(out)

    ref = reference_forward(x, weights, biases)
    assert out.shape == (BATCH, OUTPUT_DIM), out.shape
    assert jnp.allclose(out, ref, atol=1e-2, rtol=1e-2), "mismatch vs reference"

    print("KERNEL_OK")
</pallas_src>

<mosaic_0001>
module attributes {stable_mosaic.version = 11 : i64} {
  func.func @_mlp_kernel(%arg0: i32, %arg1: memref<16x4xbf16, #tpu.memory_space<vmem>>, %arg2: memref<512x256xbf16, #tpu.memory_space<vmem>>, %arg3: memref<7x128x128xbf16, #tpu.memory_space<vmem>>, %arg4: memref<12x512xf32, #tpu.memory_space<vmem>>, %arg5: memref<16x128xf32, #tpu.memory_space<vmem>>) attributes {dimension_semantics = [#tpu.dimension_semantics<parallel>], iteration_bounds = array<i64: 1>, scalar_prefetch = 0 : i64, scratch_operands = 0 : i64, tpu.core_type = #tpu.core_type<tc>, window_params = [{transform_indices = @transform_0, window_bounds = array<i64: 16, 4>}, {pipeline_mode = #tpu.pipeline_mode<synchronous>, transform_indices = @transform_1, window_bounds = array<i64: 512, 256>}, {pipeline_mode = #tpu.pipeline_mode<synchronous>, transform_indices = @transform_2, window_bounds = array<i64: 7, 128, 128>}, {pipeline_mode = #tpu.pipeline_mode<synchronous>, transform_indices = @transform_3, window_bounds = array<i64: 12, 512>}, {transform_indices = @transform_4, window_bounds = array<i64: 16, 128>}]} {
    %c8 = arith.constant 8 : index
    %c0 = arith.constant 0 : index
    %0 = vector.load %arg4[%c8, %c0] : memref<12x512xf32, #tpu.memory_space<vmem>>, vector<4x512xf32>
    %1 = arith.truncf %0 : vector<4x512xf32> to vector<4x512xbf16>
    %c0_0 = arith.constant 0 : index
    %c0_1 = arith.constant 0 : index
    %2 = vector.load %arg1[%c0_0, %c0_1] : memref<16x4xbf16, #tpu.memory_space<vmem>>, vector<16x4xbf16>
    %cst = arith.constant dense<0.000000e+00> : vector<16x512xf32>
    %3 = tpu.matmul %2, %1, %cst {dimension_numbers = #tpu.dot_dimension_numbers<[1], [0], [0], [1], [0, 0, 1, 1], [], []>} : vector<16x4xbf16>, vector<4x512xbf16>, vector<16x512xf32> -> vector<16x512xf32>
    %c0_2 = arith.constant 0 : index
    %c0_3 = arith.constant 0 : index
    %4 = vector.load %arg4[%c0_2, %c0_3] : memref<12x512xf32, #tpu.memory_space<vmem>>, vector<1x512xf32>
    %5 = vector.broadcast %4 : vector<1x512xf32> to vector<16x512xf32>
    %6 = arith.addf %3, %5 : vector<16x512xf32>
    %cst_4 = arith.constant 0.000000e+00 : f32
    %7 = vector.broadcast %cst_4 : f32 to vector<16x512xf32>
    %8 = arith.maximumf %6, %7 : vector<16x512xf32>
    %9 = arith.truncf %8 : vector<16x512xf32> to vector<16x512xbf16>
    %c0_5 = arith.constant 0 : index
    %c0_6 = arith.constant 0 : index
    %10 = vector.load %arg2[%c0_5, %c0_6] : memref<512x256xbf16, #tpu.memory_space<vmem>>, vector<512x256xbf16>
    %cst_7 = arith.constant dense<0.000000e+00> : vector<16x256xf32>
    %11 = tpu.matmul %9, %10, %cst_7 {dimension_numbers = #tpu.dot_dimension_numbers<[1], [0], [0], [1], [0, 0, 1, 1], [], []>} : vector<16x512xbf16>, vector<512x256xbf16>, vector<16x256xf32> -> vector<16x256xf32>
    %c1 = arith.constant 1 : index
    %c0_8 = arith.constant 0 : index
    %12 = vector.load %arg4[%c1, %c0_8] : memref<12x512xf32, #tpu.memory_space<vmem>>, vector<1x256xf32>
    %13 = vector.broadcast %12 : vector<1x256xf32> to vector<16x256xf32>
    %14 = arith.addf %11, %13 : vector<16x256xf32>
    %cst_9 = arith.constant 0.000000e+00 : f32
    %15 = vector.broadcast %cst_9 : f32 to vector<16x256xf32>
    %16 = arith.maximumf %14, %15 : vector<16x256xf32>
    %17 = vector.extract_strided_slice %16 {offsets = [0, 0], sizes = [16, 128], strides = [1, 1]} : vector<16x256xf32> to vector<16x128xf32>
    %18 = arith.truncf %17 : vector<16x128xf32> to vector<16x128xbf16>
    %c0_10 = arith.constant 0 : index
    %c0_11 = arith.constant 0 : index
    %c0_12 = arith.constant 0 : index
    %19 = vector.load %arg3[%c0_10, %c0_11, %c0_12] : memref<7x128x128xbf16, #tpu.memory_space<vmem>>, vector<1x128x128xbf16>
    %20 = vector.shape_cast %19 : vector<1x128x128xbf16> to vector<128x128xbf16>
    %cst_13 = arith.constant dense<0.000000e+00> : vector<16x128xf32>
    %21 = tpu.matmul %18, %20, %cst_13 {dimension_numbers = #tpu.dot_dimension_numbers<[1], [0], [0], [1], [0, 0, 1, 1], [], []>} : vector<16x128xbf16>, vector<128x128xbf16>, vector<16x128xf32> -> vector<16x128xf32>
    %22 = vector.extract_strided_slice %16 {offsets = [0, 128], sizes = [16, 128], strides = [1, 1]} : vector<16x256xf32> to vector<16x128xf32>
    %23 = arith.truncf %22 : vector<16x128xf32> to vector<16x128xbf16>
    %c1_14 = arith.constant 1 : index
    %c0_15 = arith.constant 0 : index
    %c0_16 = arith.constant 0 : index
    %24 = vector.load %arg3[%c1_14, %c0_15, %c0_16] : memref<7x128x128xbf16, #tpu.memory_space<vmem>>, vector<1x128x128xbf16>
    %25 = vector.shape_cast %24 : vector<1x128x128xbf16> to vector<128x128xbf16>
    %cst_17 = arith.constant dense<0.000000e+00> : vector<16x128xf32>
    %26 = tpu.matmul %23, %25, %cst_17 {dimension_numbers = #tpu.dot_dimension_numbers<[1], [0], [0], [1], [0, 0, 1, 1], [], []>} : vector<16x128xbf16>, vector<128x128xbf16>, vector<16x128xf32> -> vector<16x128xf32>
    %27 = arith.addf %21, %26 : vector<16x128xf32>
    %c2 = arith.constant 2 : index
    %c0_18 = arith.constant 0 : index
    %28 = vector.load %arg4[%c2, %c0_18] : memref<12x512xf32, #tpu.memory_space<vmem>>, vector<1x128xf32>
    %29 = vector.broadcast %28 : vector<1x128xf32> to vector<16x128xf32>
    %30 = arith.addf %27, %29 : vector<16x128xf32>
    %cst_19 = arith.constant 0.000000e+00 : f32
    %31 = vector.broadcast %cst_19 : f32 to vector<16x128xf32>
    %32 = arith.maximumf %30, %31 : vector<16x128xf32>
    %33 = arith.truncf %32 : vector<16x128xf32> to vector<16x128xbf16>
    %c2_20 = arith.constant 2 : index
    %c0_21 = arith.constant 0 : index
    %c0_22 = arith.constant 0 : index
    %34 = vector.load %arg3[%c2_20, %c0_21, %c0_22] : memref<7x128x128xbf16, #tpu.memory_space<vmem>>, vector<1x128x128xbf16>
    %35 = vector.shape_cast %34 : vector<1x128x128xbf16> to vector<128x128xbf16>
    %cst_23 = arith.constant dense<0.000000e+00> : vector<16x128xf32>
    %36 = tpu.matmul %33, %35, %cst_23 {dimension_numbers = #tpu.dot_dimension_numbers<[1], [0], [0], [1], [0, 0, 1, 1], [], []>} : vector<16x128xbf16>, vector<128x128xbf16>, vector<16x128xf32> -> vector<16x128xf32>
    %c3 = arith.constant 3 : index
    %c0_24 = arith.constant 0 : index
    %37 = vector.load %arg4[%c3, %c0_24] : memref<12x512xf32, #tpu.memory_space<vmem>>, vector<1x128xf32>
    %38 = vector.broadcast %37 : vector<1x128xf32> to vector<16x128xf32>
    %39 = arith.addf %36, %38 : vector<16x128xf32>
    %cst_25 = arith.constant 0.000000e+00 : f32
    %40 = vector.broadcast %cst_25 : f32 to vector<16x128xf32>
    %41 = arith.maximumf %39, %40 : vector<16x128xf32>
    %42 = arith.truncf %41 : vector<16x128xf32> to vector<16x128xbf16>
    %c3_26 = arith.constant 3 : index
    %c0_27 = arith.constant 0 : index
    %c0_28 = arith.constant 0 : index
    %43 = vector.load %arg3[%c3_26, %c0_27, %c0_28] : memref<7x128x128xbf16, #tpu.memory_space<vmem>>, vector<1x128x128xbf16>
    %44 = vector.shape_cast %43 : vector<1x128x128xbf16> to vector<128x128xbf16>
    %cst_29 = arith.constant dense<0.000000e+00> : vector<16x128xf32>
    %45 = tpu.matmul %42, %44, %cst_29 {dimension_numbers = #tpu.dot_dimension_numbers<[1], [0], [0], [1], [0, 0, 1, 1], [], []>} : vector<16x128xbf16>, vector<128x128xbf16>, vector<16x128xf32> -> vector<16x128xf32>
    %c4 = arith.constant 4 : index
    %c0_30 = arith.constant 0 : index
    %46 = vector.load %arg4[%c4, %c0_30] : memref<12x512xf32, #tpu.memory_space<vmem>>, vector<1x128xf32>
    %47 = vector.broadcast %46 : vector<1x128xf32> to vector<16x128xf32>
    %48 = arith.addf %45, %47 : vector<16x128xf32>
    %cst_31 = arith.constant 0.000000e+00 : f32
    %49 = vector.broadcast %cst_31 : f32 to vector<16x128xf32>
    %50 = arith.maximumf %48, %49 : vector<16x128xf32>
    %51 = arith.truncf %50 : vector<16x128xf32> to vector<16x128xbf16>
    %c4_32 = arith.constant 4 : index
    %c0_33 = arith.constant 0 : index
    %c0_34 = arith.constant 0 : index
    %52 = vector.load %arg3[%c4_32, %c0_33, %c0_34] : memref<7x128x128xbf16, #tpu.memory_space<vmem>>, vector<1x128x128xbf16>
    %53 = vector.shape_cast %52 : vector<1x128x128xbf16> to vector<128x128xbf16>
    %cst_35 = arith.constant dense<0.000000e+00> : vector<16x128xf32>
    %54 = tpu.matmul %51, %53, %cst_35 {dimension_numbers = #tpu.dot_dimension_numbers<[1], [0], [0], [1], [0, 0, 1, 1], [], []>} : vector<16x128xbf16>, vector<128x128xbf16>, vector<16x128xf32> -> vector<16x128xf32>
    %c5 = arith.constant 5 : index
    %c0_36 = arith.constant 0 : index
    %55 = vector.load %arg4[%c5, %c0_36] : memref<12x512xf32, #tpu.memory_space<vmem>>, vector<1x128xf32>
    %56 = vector.broadcast %55 : vector<1x128xf32> to vector<16x128xf32>
    %57 = arith.addf %54, %56 : vector<16x128xf32>
    %cst_37 = arith.constant 0.000000e+00 : f32
    %58 = vector.broadcast %cst_37 : f32 to vector<16x128xf32>
    %59 = arith.maximumf %57, %58 : vector<16x128xf32>
    %60 = arith.truncf %59 : vector<16x128xf32> to vector<16x128xbf16>
    %c5_38 = arith.constant 5 : index
    %c0_39 = arith.constant 0 : index
    %c0_40 = arith.constant 0 : index
    %61 = vector.load %arg3[%c5_38, %c0_39, %c0_40] : memref<7x128x128xbf16, #tpu.memory_space<vmem>>, vector<1x128x128xbf16>
    %62 = vector.shape_cast %61 : vector<1x128x128xbf16> to vector<128x128xbf16>
    %cst_41 = arith.constant dense<0.000000e+00> : vector<16x128xf32>
    %63 = tpu.matmul %60, %62, %cst_41 {dimension_numbers = #tpu.dot_dimension_numbers<[1], [0], [0], [1], [0, 0, 1, 1], [], []>} : vector<16x128xbf16>, vector<128x128xbf16>, vector<16x128xf32> -> vector<16x128xf32>
    %c6 = arith.constant 6 : index
    %c0_42 = arith.constant 0 : index
    %64 = vector.load %arg4[%c6, %c0_42] : memref<12x512xf32, #tpu.memory_space<vmem>>, vector<1x128xf32>
    %65 = vector.broadcast %64 : vector<1x128xf32> to vector<16x128xf32>
    %66 = arith.addf %63, %65 : vector<16x128xf32>
    %cst_43 = arith.constant 0.000000e+00 : f32
    %67 = vector.broadcast %cst_43 : f32 to vector<16x128xf32>
    %68 = arith.maximumf %66, %67 : vector<16x128xf32>
    %69 = arith.truncf %68 : vector<16x128xf32> to vector<16x128xbf16>
    %c6_44 = arith.constant 6 : index
    %c0_45 = arith.constant 0 : index
    %c0_46 = arith.constant 0 : index
    %70 = vector.load %arg3[%c6_44, %c0_45, %c0_46] : memref<7x128x128xbf16, #tpu.memory_space<vmem>>, vector<1x128x128xbf16>
    %71 = vector.shape_cast %70 : vector<1x128x128xbf16> to vector<128x128xbf16>
    %cst_47 = arith.constant dense<0.000000e+00> : vector<16x128xf32>
    %72 = tpu.matmul %69, %71, %cst_47 {dimension_numbers = #tpu.dot_dimension_numbers<[1], [0], [0], [1], [0, 0, 1, 1], [], []>} : vector<16x128xbf16>, vector<128x128xbf16>, vector<16x128xf32> -> vector<16x128xf32>
    %c7 = arith.constant 7 : index
    %c0_48 = arith.constant 0 : index
    %73 = vector.load %arg4[%c7, %c0_48] : memref<12x512xf32, #tpu.memory_space<vmem>>, vector<1x128xf32>
    %74 = vector.broadcast %73 : vector<1x128xf32> to vector<16x128xf32>
    %75 = arith.addf %72, %74 : vector<16x128xf32>
    %c0_49 = arith.constant 0 : index
    %c0_50 = arith.constant 0 : index
    %76 = vector.load %arg5[%c0_49, %c0_50] : memref<16x128xf32, #tpu.memory_space<vmem>>, vector<16x128xf32>
    tpu.vector_store %arg5[%c0_49, %c0_50], %75 {strides = array<i32>} : memref<16x128xf32, #tpu.memory_space<vmem>>, vector<16x128xf32>,
    return
  }
  func.func @transform_0(%arg0: i32) -> (i32, i32) {
    %c0_i32 = arith.constant 0 : i32
    %c0_i32_0 = arith.constant 0 : i32
    return %arg0, %c0_i32 : i32, i32
  }
  func.func @transform_1(%arg0: i32) -> (i32, i32) {
    %c0_i32 = arith.constant 0 : i32
    %c0_i32_0 = arith.constant 0 : i32
    %c0_i32_1 = arith.constant 0 : i32
    return %c0_i32, %c0_i32_0 : i32, i32
  }
  func.func @transform_2(%arg0: i32) -> (i32, i32, i32) {
    %c0_i32 = arith.constant 0 : i32
    %c0_i32_0 = arith.constant 0 : i32
    %c0_i32_1 = arith.constant 0 : i32
    %c0_i32_2 = arith.constant 0 : i32
    return %c0_i32, %c0_i32_0, %c0_i32_1 : i32, i32, i32
  }
  func.func @transform_3(%arg0: i32) -> (i32, i32) {
    %c0_i32 = arith.constant 0 : i32
    %c0_i32_0 = arith.constant 0 : i32
    %c0_i32_1 = arith.constant 0 : i32
    return %c0_i32, %c0_i32_0 : i32, i32
  }
  func.func @transform_4(%arg0: i32) -> (i32, i32) {
    %c0_i32 = arith.constant 0 : i32
    %c0_i32_0 = arith.constant 0 : i32
    return %arg0, %c0_i32 : i32, i32
  }
}

</mosaic_0001>

<bundles_post_ra>
// kernel: tpu_custom_call.1
= control target key start
LH: loop header
LB: loop body
LE: loop exit
PB: predicated region body
PF: predicated region fallthrough
CT: control target
= control target key end

     0   :  { %9 = vsyncpa [#allocation3], 0  ;;  %s2266_s0 = inlined_call_operand.vmem [shape: bf16[16,4], index: 0, kind: input, shape index: {}]   ;;  %s2267_s1 = inlined_call_operand.hbm [shape: bf16[512,256], index: 1, kind: input, shape index: {}]   ;;  %s2268_s2 = inlined_call_operand.hbm [shape: bf16[7,128,128], index: 2, kind: input, shape index: {}]   ;;  %s2269_s3 = inlined_call_operand.hbm [shape: f32[12,512], index: 3, kind: input, shape index: {}]   ;;  %s2270_s4 = inlined_call_operand.hbm [shape: f32[16,128], index: 4, kind: output, shape index: {}]  }
   0x1   :  { %10 = vsyncpa [#allocation6], 0 }
   0x2   :  { %11 = vsyncpa [#allocation4], 0  ;;  %s2081_s15 = smov [#allocation5]   ;;  %s1987_s19 = scalar_lea.hbm %s2268_s2, 7168 }
   0x3   :  { %s31_s16 = sshll.u32 %s2081_s15, 4  ;;  %p1988_p0 = scmp.ne.s32.totalorder %s2268_s2, %s1987_s19  ;;  %s32_s16 = int_to_ptr.vmem [resolvable:$true] %s31_s16 }
   0x4   :  { %p1991_p1 = scmp.lt.u32.totalorder %s1987_s19, %s2268_s2 }
   0x6   :  { %p1993_p2 = pnand %p1991_p1, %p1988_p0 }
   0x8   :  { %1996 = shalt.err (!%p1993_p2)
}
   0x9   :  { %s1997_s24 = scalar_lea.vmem %s32_s16, 7168  ;;  %p2002_p4 = scmp.lt.s32.totalorder %s32_s16, %s32_s16 }
   0xa   :  { %p1998_p3 = scmp.ne.s32.totalorder %s32_s16, %s1997_s24  ;;  %p2003_p5 = scmp.lt.s32.totalorder %s1997_s24, %s1997_s24 }
   0xc   :  { %p2004_p6 = por %p2003_p5, %p2002_p4 }
   0xe   :  { %p2005_p7 = pnand %p2004_p6, %p1998_p3 }
  0x10   :  { %2008 = shalt.err (!%p2005_p7)
}
  0x11   :  { %s2082_s25 = smov 64   ;;  %s2083_s26 = smov 4  }
  0x12   :  { %37 = dma.hbm_to_vmem [thread:$0]  %s2268_s2, 7168, %s32_s16, [#allocation6], %s2082_s25, %s2082_s25, %s2083_s26  }
  0x13   :  { %s2084_s29 = smov [#allocation2]   ;;  %s2009_s7 = scalar_lea.hbm %s2267_s1, 8192 }
  0x14   :  { %s19_s30 = sshll.u32 %s2084_s29, 4  ;;  %p2010_p8 = scmp.ne.s32.totalorder %s2267_s1, %s2009_s7  ;;  %s20_s30 = int_to_ptr.vmem [resolvable:$true] %s19_s30 }
  0x15   :  { %p2013_p9 = scmp.lt.u32.totalorder %s2009_s7, %s2267_s1 }
  0x17   :  { %p2015_p10 = pnand %p2013_p9, %p2010_p8 }
  0x19   :  { %2018 = shalt.err (!%p2015_p10)
}
  0x1a   :  { %s2019_s12 = scalar_lea.vmem %s20_s30, 8192  ;;  %p2024_p12 = scmp.lt.s32.totalorder %s20_s30, %s20_s30 }
  0x1b   :  { %p2020_p11 = scmp.ne.s32.totalorder %s20_s30, %s2019_s12  ;;  %p2025_p13 = scmp.lt.s32.totalorder %s2019_s12, %s2019_s12 }
  0x1d   :  { %p2026_p0 = por %p2025_p13, %p2024_p12 }
  0x1f   :  { %p2027_p1 = pnand %p2026_p0, %p2020_p11 }
  0x21   :  { %2030 = shalt.err (!%p2027_p1)
}
  0x22   :  { %s2085_s2 = smov 128   ;;  %s2086_s13 = smov 8  }
  0x23   :  { %25 = dma.hbm_to_vmem [thread:$0]  %s2267_s1, 8192, %s20_s30, [#allocation3], %s2085_s2, %s2085_s2, %s2086_s13  }
  0x24   :  { %s2087_s16 = smov [#allocation7]   ;;  %s2031_s20 = scalar_lea.hbm %s2269_s3, 1024 }
  0x25   :  { %s43_s17 = sshll.u32 %s2087_s16, 4  ;;  %p2032_p2 = scmp.ne.s32.totalorder %s2269_s3, %s2031_s20  ;;  %s44_s17 = int_to_ptr.vmem [resolvable:$true] %s43_s17 }
  0x26   :  { %p2035_p3 = scmp.lt.u32.totalorder %s2031_s20, %s2269_s3 }
  0x28   :  { %p2037_p4 = pnand %p2035_p3, %p2032_p2 }
  0x2a   :  { %2040 = shalt.err (!%p2037_p4)
}
  0x2b   :  { %s2041_s25 = scalar_lea.vmem %s44_s17, 1024  ;;  %p2046_p6 = scmp.lt.s32.totalorder %s44_s17, %s44_s17 }
  0x2c   :  { %p2042_p5 = scmp.ne.s32.totalorder %s44_s17, %s2041_s25  ;;  %p2047_p7 = scmp.lt.s32.totalorder %s2041_s25, %s2041_s25 }
  0x2e   :  { %p2048_p8 = por %p2047_p7, %p2046_p6 }
  0x30   :  { %p2049_p9 = pnand %p2048_p8, %p2042_p5 }
  0x32   :  { %2052 = shalt.err (!%p2049_p9)
}
  0x33   :  { %s2088_s1 = smov 512   ;;  %s2089_s26 = smov 32  }
  0x34   :  { %49 = dma.hbm_to_vmem [thread:$0]  %s2269_s3, 1024, %s44_s17, [#allocation6], %s2088_s1, %s2088_s1, %s2089_s26  }
  0x35   :  { %2075 = dma.done.wait [#allocation3], 8192  }
  0x36   :  { %2076 = vsyncadd [#allocation3], 4294959104 }
  0x37   :  { %2077 = dma.done.wait [#allocation6], 8192  }
  0x38   :  { %2078 = vsyncadd [#allocation6], 4294959104  ;;  %v2090_v0 = vmov 0   ;;  %vm101_vm0 = vcmask 1041408   ;;  %v61_v1 = vld [vmem:[#allocation7 + $0x28] sm:$0xf]  ;;  %v72_v52 = vlaneseq }
  0x39   :  { %146 = vmatprep.mubr.bf16.mxu1 %v2090_v0  ;;  %v60_v2 = vld [vmem:[#allocation7 + $0x20] sm:$0xf]  ;;  %v65_v3 = vpack.c.bf16 %v61_v1, %v61_v1  ;;  %v1834_v5 = vld [vmem:[%s2266_s0] sm:$0xff]   ;;  %v62_v8 = vld [vmem:[#allocation7 + $0x30] sm:$0xf]  ;;  %vm97_vm1 = vcmask 31744  }
  0x3a   :  { %v64_v4 = vpack.c.bf16 %v60_v2, %v60_v2  ;;  %v63_v6 = vld [vmem:[#allocation7 + $0x38] sm:$0xf]  ;;  %v66_v10 = vpack.c.bf16 %v62_v8, %v62_v8  ;;  %v1835_v11 = vld [vmem:[#allocation2 + $0x4] ss:$8 sps:$4 sm:$0xff]   ;;  %v1837_v12 = vld [vmem:[#allocation2] ss:$8 sps:$4 sm:$0xff]  }
  0x3b   :  { %v67_v7 = vpack.c.bf16 %v63_v6, %v63_v6  ;;  %1486 = vmatprep.subr.msk.bf16.mxu1 %vm101_vm0, %v65_v3  ;;  %v1838_v13 = vld [vmem:[#allocation2 + $0x14] ss:$8 sps:$4 sm:$0xff]   ;;  %609 = vmatprep.subr.bf16.mxu0 %v1835_v11  ;;  %v1840_v15 = vld [vmem:[#allocation2 + $0x10] ss:$8 sps:$4 sm:$0xff]   ;;  %v1841_v16 = vld [vmem:[#allocation2 + $0x24] ss:$8 sps:$4 sm:$0xff]  }
  0x3c   :  { %v103_v9 = vsel %vm101_vm0, %v64_v4, 0  ;;  %v109_v14 = vsel %vm101_vm0, %v66_v10, 0  ;;  %610 = vmatpush1.bf16.msra.mxu0 %v1837_v12  ;;  %v1843_v17 = vld [vmem:[#allocation2 + $0x20] ss:$8 sps:$4 sm:$0xff]   ;;  %v1844_v18 = vld [vmem:[#allocation2 + $0x34] ss:$8 sps:$4 sm:$0xff]  }
  0x3d   :  { %115 = vmatpush1.bf16.msra.mxu1 %v103_v9  ;;  %611 = vmatprep.subr.bf16.mxu0 %v1838_v13  ;;  %v1846_v19 = vld [vmem:[#allocation2 + $0x30] ss:$8 sps:$4 sm:$0xff]   ;;  %v1847_v20 = vld [vmem:[#allocation2 + $0x44] ss:$8 sps:$4 sm:$0xff]   ;;  %v1849_v21 = vld [vmem:[#allocation2 + $0x40] ss:$8 sps:$4 sm:$0xff]  }
  0x3e   :  { %1488 = vmatprep.subr.msk.bf16.mxu1 %vm101_vm0, %v67_v7  ;;  %v1850_v22 = vld [vmem:[#allocation2 + $0x54] ss:$8 sps:$4 sm:$0xff]   ;;  %v1852_v23 = vld [vmem:[#allocation2 + $0x50] ss:$8 sps:$4 sm:$0xff]   ;;  %v1853_v24 = vld [vmem:[#allocation2 + $0x64] ss:$8 sps:$4 sm:$0xff]  }
  0x3f   :  { %v1855_v25 = vld [vmem:[#allocation2 + $0x60] ss:$8 sps:$4 sm:$0xff]   ;;  %v1856_v26 = vld [vmem:[#allocation2 + $0x74] ss:$8 sps:$4 sm:$0xff]   ;;  %v1858_v27 = vld [vmem:[#allocation2 + $0x70] ss:$8 sps:$4 sm:$0xff]  }
  0x40   :  { %1487 = vmatmul.mubr.msk.bf16.vlgmr.msra.gmra.mrb[0].mxu1 %vm97_vm1, %v1834_v5  ;;  %612 = vmatpush1.bf16.msra.mxu0 %v1840_v15  ;;  %v1859_v28 = vld [vmem:[#allocation2 + $0x84] ss:$8 sps:$4 sm:$0xff]   ;;  %v1861_v29 = vld [vmem:[#allocation2 + $0x80] ss:$8 sps:$4 sm:$0xff]   ;;  %v1862_v30 = vld [vmem:[#allocation2 + $0x94] ss:$8 sps:$4 sm:$0xff]  }
  0x41   :  { %158 = vmatpush1.bf16.msra.mxu1 %v109_v14  ;;  %189 = vmatprep.mubr.bf16.mxu1 %v2090_v0  ;;  %v1864_v31 = vld [vmem:[#allocation2 + $0x90] ss:$8 sps:$4 sm:$0xff]   ;;  %v1865_v32 = vld [vmem:[#allocation2 + $0xa4] ss:$8 sps:$4 sm:$0xff]   ;;  %v1867_v33 = vld [vmem:[#allocation2 + $0xa0] ss:$8 sps:$4 sm:$0xff]  }
  0x42   :  { %613 = vmatprep.subr.bf16.mxu0 %v1841_v16  ;;  %v1868_v34 = vld [vmem:[#allocation2 + $0xb4] ss:$8 sps:$4 sm:$0xff]   ;;  %v1870_v35 = vld [vmem:[#allocation2 + $0xb0] ss:$8 sps:$4 sm:$0xff]   ;;  %v1871_v36 = vld [vmem:[#allocation2 + $0xc4] ss:$8 sps:$4 sm:$0xff]  }
  0x43   :  { %v1873_v37 = vld [vmem:[#allocation2 + $0xc0] ss:$8 sps:$4 sm:$0xff]   ;;  %v1874_v38 = vld [vmem:[#allocation2 + $0xd4] ss:$8 sps:$4 sm:$0xff]   ;;  %v1876_v39 = vld [vmem:[#allocation2 + $0xd0] ss:$8 sps:$4 sm:$0xff]  }
  0x44   :  { %614 = vmatpush1.bf16.msra.mxu0 %v1843_v17  ;;  %v1877_v40 = vld [vmem:[#allocation2 + $0xe4] ss:$8 sps:$4 sm:$0xff]   ;;  %v1879_v41 = vld [vmem:[#allocation2 + $0xe0] ss:$8 sps:$4 sm:$0xff]   ;;  %v1880_v42 = vld [vmem:[#allocation2 + $0xf4] ss:$8 sps:$4 sm:$0xff]  }
  0x45   :  { %615 = vmatprep.subr.bf16.mxu0 %v1844_v18  ;;  %v1882_v43 = vld [vmem:[#allocation2 + $0xf0] ss:$8 sps:$4 sm:$0xff]   ;;  %v1885_v44 = vld [vmem:[#allocation2 + $0x104] ss:$8 sps:$4 sm:$0xff]   ;;  %v2091_v46 = vmov 0.0   ;;  %v2174_v53 = vshrl.u32 %v72_v52, 7 }
  0x46   :  { %v1931_v45 = vld [vmem:[#allocation5 + $0x40] sm:$0xff]   ;;  %1673 = vmatprep.subr.bf16.mxu1 %v2091_v46  ;;  %v1932_v47 = vld [vmem:[#allocation5 + $0x48] sm:$0xff]   ;;  %v1933_v48 = vld [vmem:[#allocation5 + $0x50] sm:$0xff]   ;;  %vm2092_vm2 = vmmov 0   ;;  %s2093_s0 = smov [#allocation8]  }
  0x47   :  { %v1934_v49 = vld [vmem:[#allocation5 + $0x58] sm:$0xff]   ;;  %v1935_v50 = vld [vmem:[#allocation5 + $0x60] sm:$0xff]   ;;  %v1936_v51 = vld [vmem:[#allocation5 + $0x68] sm:$0xff]   ;;  %v74_v54 = vsub.s32 0, %v2174_v53  ;;  %v78_v56 = vsub.s32 1, %v2174_v53  ;;  %v82_v62 = vsub.s32 2, %v2174_v53 }
  0x48   :  { %1489 = vmatmul.mubr.msk.bf16.vlgmr.msra.gmra.mrb[4].mxu1 %vm97_vm1, %v1834_v5  ;;  %616 = vmatpush1.bf16.msra.mxu0 %v1846_v19  ;;  %v70_v55 = vld [vmem:[#allocation7] ss:$8 sm:$0xf]  ;;  %v86_v1 = vsub.s32 3, %v2174_v53  ;;  %v1888_v15 = vld [vmem:[#allocation2 + $0x114] ss:$8 sps:$4 sm:$0xff]  }
  0x49   :  { %617 = vmatprep.subr.bf16.mxu0 %v1847_v20  ;;  %1674 = vmatpush3.bf16.msra.mxu1 %v1931_v45  ;;  %v75_v57 = vrot.slane %v70_v55, %v74_v54  ;;  %v79_v58 = vrot.slane %v70_v55, %v78_v56  ;;  %v83_v7 = vrot.slane %v70_v55, %v82_v62  ;;  %v1883_v13 = vld [vmem:[#allocation2 + $0x100] ss:$8 sps:$4 sm:$0xff]   ;;  %v1910_v45 = vld [vmem:[#allocation2 + $0x190] ss:$8 sps:$4 sm:$0xff]   ;;  %s1472_s3 = sshll.u32 %s2093_s0, 4  ;;  %s1473_s3 = int_to_ptr.vmem [resolvable:$true] %s1472_s3 }
  0x4a   :  { %1675 = vmatprep.subr.bf16.mxu1 %v2091_v46  ;;  %v87_v10 = vrot.slane %v70_v55, %v86_v1  ;;  %v1919_v52 = vld [vmem:[#allocation2 + $0x1c0] ss:$8 sps:$4 sm:$0xff]   ;;  %v1924_v55 = vld [vmem:[#allocation2 + $0x1d4] ss:$8 sps:$4 sm:$0xff]   ;;  %1689 = vmatprep.mubr.msk.bf16.mxu1 %vm2092_vm2, %v2091_v46  ;;  %s2053_s5 = scalar_lea.vmem %s1473_s3, 256  ;;  %p2058_p11 = scmp.lt.s32.totalorder %s1473_s3, %s1473_s3 }
  0x4b   :  { %v1937_v62 = vld [vmem:[#allocation5 + $0x70] sm:$0xff]   ;;  %p2054_p10 = scmp.ne.s32.totalorder %s1473_s3, %s2053_s5  ;;  %p2059_p12 = scmp.lt.s32.totalorder %s2053_s5, %s2053_s5 }
  0x4c   :  { %618 = vmatpush1.bf16.msra.mxu0 %v1849_v21  ;;  %v1941_v53 = vld [vmem:[#allocation5 + $0x10] sm:$0xff]  }
  0x4d   :  { %619 = vmatprep.subr.bf16.mxu0 %v1850_v22  ;;  %1676 = vmatpush3.bf16.msra.mxu1 %v1932_v47  ;;  %v1915_v47 = vld [vmem:[#allocation2 + $0x1a4] ss:$8 sps:$4 sm:$0xff]   ;;  %p2060_p13 = por %p2059_p12, %p2058_p11 }
  0x4e   :  { %1677 = vmatprep.subr.bf16.mxu1 %v2091_v46 }
  0x4f   :  { %p2061_p0 = pnand %p2060_p13, %p2054_p10 }
  0x50   :  { %620 = vmatpush1.bf16.msra.mxu0 %v1852_v23  ;;  %v1886_v23 = vld [vmem:[#allocation2 + $0x110] ss:$8 sps:$4 sm:$0xff]  }
  0x51   :  { %621 = vmatprep.subr.bf16.mxu0 %v1853_v24  ;;  %1678 = vmatpush3.bf16.msra.mxu1 %v1933_v48  ;;  %v1913_v48 = vld [vmem:[#allocation2 + $0x1a0] ss:$8 sps:$4 sm:$0xff]  }
  0x52   :  { %1679 = vmatprep.subr.bf16.mxu1 %v2091_v46 }
  0x54   :  { %622 = vmatpush1.bf16.msra.mxu0 %v1855_v25 }
  0x55   :  { %623 = vmatprep.subr.bf16.mxu0 %v1856_v26  ;;  %1680 = vmatpush3.bf16.msra.mxu1 %v1934_v49  ;;  %v1891_v26 = vld [vmem:[#allocation2 + $0x124] ss:$8 sps:$4 sm:$0xff]   ;;  %v1918_v49 = vld [vmem:[#allocation2 + $0x1b4] ss:$8 sps:$4 sm:$0xff]  }
  0x56   :  { %1681 = vmatprep.subr.bf16.mxu1 %v2091_v46 }
  0x58   :  { %624 = vmatpush1.bf16.msra.mxu0 %v1858_v27 }
  0x59   :  { %625 = vmatprep.subr.bf16.mxu0 %v1859_v28  ;;  %1682 = vmatpush3.bf16.msra.mxu1 %v1935_v50  ;;  %v1916_v50 = vld [vmem:[#allocation2 + $0x1b0] ss:$8 sps:$4 sm:$0xff]  }
  0x5a   :  { %1683 = vmatprep.subr.bf16.mxu1 %v2091_v46 }
  0x5c   :  { %626 = vmatpush1.bf16.msra.mxu0 %v1861_v29 }
  0x5d   :  { %627 = vmatprep.subr.bf16.mxu0 %v1862_v30  ;;  %1684 = vmatpush3.bf16.msra.mxu1 %v1936_v51  ;;  %v1889_v30 = vld [vmem:[#allocation2 + $0x120] ss:$8 sps:$4 sm:$0xff]   ;;  %v1921_v51 = vld [vmem:[#allocation2 + $0x1c4] ss:$8 sps:$4 sm:$0xff]  }
  0x5e   :  { %1685 = vmatprep.subr.bf16.mxu1 %v2091_v46 }
  0x60   :  { %628 = vmatpush1.bf16.msra.mxu0 %v1864_v31 }
  0x61   :  { %629 = vmatprep.subr.bf16.mxu0 %v1865_v32  ;;  %v1894_v32 = vld [vmem:[#allocation2 + $0x134] ss:$8 sps:$4 sm:$0xff]   ;;  %1686 = vmatpush3.bf16.msra.mxu1 %v1937_v62  ;;  %v1967_v62 = vld [vmem:[#allocation5 + $0x120] sm:$0xff]  }
  0x62   :  { %1687 = vmatprep.subr.bf16.mxu1 %v2091_v46 }
  0x64   :  { %630 = vmatpush1.bf16.msra.mxu0 %v1867_v33  ;;  %v1892_v33 = vld [vmem:[#allocation2 + $0x130] ss:$8 sps:$4 sm:$0xff]  }
  0x65   :  { %631 = vmatprep.subr.bf16.mxu0 %v1868_v34  ;;  %v1897_v34 = vld [vmem:[#allocation2 + $0x144] ss:$8 sps:$4 sm:$0xff]  }
  0x68   :  { %632 = vmatpush1.bf16.msra.mxu0 %v1870_v35  ;;  %v1895_v35 = vld [vmem:[#allocation2 + $0x140] ss:$8 sps:$4 sm:$0xff]  }
  0x69   :  { %633 = vmatprep.subr.bf16.mxu0 %v1871_v36  ;;  %v1900_v36 = vld [vmem:[#allocation2 + $0x154] ss:$8 sps:$4 sm:$0xff]  }
  0x6c   :  { %634 = vmatpush1.bf16.msra.mxu0 %v1873_v37  ;;  %v1898_v37 = vld [vmem:[#allocation2 + $0x150] ss:$8 sps:$4 sm:$0xff]  }
  0x6d   :  { %635 = vmatprep.subr.bf16.mxu0 %v1874_v38  ;;  %v1903_v38 = vld [vmem:[#allocation2 + $0x164] ss:$8 sps:$4 sm:$0xff]  }
  0x70   :  { %636 = vmatpush1.bf16.msra.mxu0 %v1876_v39  ;;  %v1901_v39 = vld [vmem:[#allocation2 + $0x160] ss:$8 sps:$4 sm:$0xff]  }
  0x71   :  { %637 = vmatprep.subr.bf16.mxu0 %v1877_v40  ;;  %v1906_v40 = vld [vmem:[#allocation2 + $0x174] ss:$8 sps:$4 sm:$0xff]  }
  0x74   :  { %638 = vmatpush1.bf16.msra.mxu0 %v1879_v41  ;;  %v1904_v41 = vld [vmem:[#allocation2 + $0x170] ss:$8 sps:$4 sm:$0xff]  }
  0x75   :  { %639 = vmatprep.subr.bf16.mxu0 %v1880_v42  ;;  %v1909_v42 = vld [vmem:[#allocation2 + $0x184] ss:$8 sps:$4 sm:$0xff]  }
  0x78   :  { %640 = vmatpush1.bf16.msra.mxu0 %v1882_v43  ;;  %v1907_v43 = vld [vmem:[#allocation2 + $0x180] ss:$8 sps:$4 sm:$0xff]  }
  0x79   :  { %652 = vmatprep.subr.bf16.mxu0 %v1885_v44  ;;  %v1912_v44 = vld [vmem:[#allocation2 + $0x194] ss:$8 sps:$4 sm:$0xff]  }
 0x113   :  { %v148_v59 = vpop.f32.mrb[0].mxu1 }
 0x114   :  { %v149_v60 = vadd.f32 %v148_v59, %v75_v57  ;;  %v150_v61 = vpop.f32.mrb[1].mxu1  ;;  %v1925_v59 = vld [vmem:[#allocation2 + $0x1e0] ss:$8 sps:$4 sm:$0xff]  }
 0x115   :  { %v151_v63 = vadd.f32 %v150_v61, %v79_v58  ;;  %v152_v0 = vpop.f32.mrb[2].mxu1  ;;  %v1928_v61 = vld [vmem:[#allocation2 + $0x1f0] ss:$8 sps:$4 sm:$0xff]  }
 0x116   :  { %v153_v2 = vadd.f32 %v152_v0, %v75_v57  ;;  %v154_v3 = vpop.f32.mrb[3].mxu1  ;;  %v200_v5 = vmax.f32 %v149_v60, 0.0  ;;  %v1922_v57 = vld [vmem:[#allocation2 + $0x1d0] ss:$8 sps:$4 sm:$0xff]   ;;  %v1930_v60 = vld [vmem:[#allocation2 + $0x1f4] ss:$8 sps:$4 sm:$0xff]  }
 0x117   :  { %v155_v4 = vadd.f32 %v154_v3, %v79_v58  ;;  %v201_v8 = vmax.f32 %v151_v63, 0.0  ;;  %v1927_v58 = vld [vmem:[#allocation2 + $0x1e4] ss:$8 sps:$4 sm:$0xff]   ;;  %v1938_v63 = vld [vmem:[#allocation5 + $0x78] sm:$0xff]  }
 0x118   :  { %v204_v6 = vmax.f32 %v153_v2, 0.0  ;;  %1688 = vmatpush3.bf16.msra.mxu1 %v1938_v63  ;;  %v277_v0 = vld [vmem:[#allocation7 + $0x1] ss:$8 sm:$0x3] }
 0x119   :  { %v205_v9 = vmax.f32 %v155_v4, 0.0  ;;  %1693 = vmatprep.subr.bf16.mxu1 %v2091_v46  ;;  %v282_v1 = vrot.slane %v277_v0, %v74_v54  ;;  %v286_v2 = vrot.slane %v277_v0, %v78_v56  ;;  %v1940_v54 = vld [vmem:[#allocation5 + $0x8] sm:$0xff]   ;;  %v1942_v56 = vld [vmem:[#allocation5 + $0x18] sm:$0xff]   ;;  %v935_v0 = vld [vmem:[#allocation7 + $0x3] ss:$0 sm:$0xff] }
 0x11a   :  { %v208_v11 = vpack.c.bf16 %v204_v6, %v200_v5  ;;  %v1968_v63 = vld [vmem:[#allocation5 + $0x128] sm:$0xff]  }
 0x11b   :  { %v209_v12 = vpack.c.bf16 %v205_v9, %v201_v8  ;;  %v191_v14 = vpop.f32.mrb[4].mxu1 }
 0x11c   :  { %v192_v16 = vadd.f32 %v191_v14, %v83_v7  ;;  %v193_v17 = vpop.f32.mrb[5].mxu1 }
 0x11d   :  { %641 = vmatprep.mubr.bf16.mxu0 %v209_v12  ;;  %v194_v18 = vadd.f32 %v193_v17, %v87_v10  ;;  %v195_v19 = vpop.f32.mrb[6].mxu1 }
 0x11e   :  { %642 = vmatmul.mubr.bf16.vlgmr.msra.gmra.mrb[0].mxu0 %v208_v11  ;;  %v202_v20 = vmax.f32 %v192_v16, 0.0  ;;  %v196_v21 = vadd.f32 %v195_v19, %v83_v7  ;;  %v197_v22 = vpop.f32.mrb[7].mxu1  ;;  %v1939_v16 = vld [vmem:[#allocation5] sm:$0xff]   ;;  %v1944_v19 = vld [vmem:[#allocation5 + $0x28] sm:$0xff]  }
 0x11f   :  { %653 = vmatpush1.bf16.msra.mxu0 %v1883_v13  ;;  %v203_v24 = vmax.f32 %v194_v18, 0.0  ;;  %v198_v25 = vadd.f32 %v197_v22, %v87_v10  ;;  %v1943_v18 = vld [vmem:[#allocation5 + $0x20] sm:$0xff]  }
 0x120   :  { %654 = vmatprep.subr.bf16.mxu0 %v1888_v15  ;;  %v206_v27 = vmax.f32 %v196_v21, 0.0  ;;  %v1946_v21 = vld [vmem:[#allocation5 + $0x38] sm:$0xff]   ;;  %v1947_v22 = vld [vmem:[#allocation5 + $0x80] sm:$0xff]  }
 0x121   :  { %v207_v28 = vmax.f32 %v198_v25, 0.0  ;;  %v1950_v25 = vld [vmem:[#allocation5 + $0x98] sm:$0xff]  }
 0x122   :  { %v210_v29 = vpack.c.bf16 %v206_v27, %v202_v20  ;;  %v1945_v20 = vld [vmem:[#allocation5 + $0x30] sm:$0xff]   ;;  %v1952_v27 = vld [vmem:[#allocation5 + $0xa8] sm:$0xff]  }
 0x123   :  { %655 = vmatpush1.bf16.msra.mxu0 %v1886_v23  ;;  %v211_v31 = vpack.c.bf16 %v207_v28, %v203_v24  ;;  %v1948_v23 = vld [vmem:[#allocation5 + $0x88] sm:$0xff]   ;;  %v1949_v24 = vld [vmem:[#allocation5 + $0x90] sm:$0xff]  }
 0x124   :  { %656 = vmatprep.subr.bf16.mxu0 %v1891_v26  ;;  %v1951_v26 = vld [vmem:[#allocation5 + $0xa0] sm:$0xff]   ;;  %v1953_v28 = vld [vmem:[#allocation5 + $0xb0] sm:$0xff]  }
 0x125   :  { %684 = vmatprep.mubr.bf16.mxu0 %v211_v31 }
 0x127   :  { %657 = vmatpush1.bf16.msra.mxu0 %v1889_v30 }
 0x128   :  { %658 = vmatprep.subr.bf16.mxu0 %v1894_v32 }
 0x12b   :  { %659 = vmatpush1.bf16.msra.mxu0 %v1892_v33 }
 0x12c   :  { %660 = vmatprep.subr.bf16.mxu0 %v1897_v34 }
 0x12f   :  { %661 = vmatpush1.bf16.msra.mxu0 %v1895_v35  ;;  %v912_v35 = vld [vmem:[#allocation7 + $0x2] ss:$0 sm:$0xff] }
 0x130   :  { %662 = vmatprep.subr.bf16.mxu0 %v1900_v36 }
 0x133   :  { %663 = vmatpush1.bf16.msra.mxu0 %v1898_v37 }
 0x134   :  { %664 = vmatprep.subr.bf16.mxu0 %v1903_v38 }
 0x137   :  { %665 = vmatpush1.bf16.msra.mxu0 %v1901_v39 }
 0x138   :  { %666 = vmatprep.subr.bf16.mxu0 %v1906_v40 }
 0x13b   :  { %667 = vmatpush1.bf16.msra.mxu0 %v1904_v41 }
 0x13c   :  { %668 = vmatprep.subr.bf16.mxu0 %v1909_v42 }
 0x13f   :  { %669 = vmatpush1.bf16.msra.mxu0 %v1907_v43 }
 0x140   :  { %670 = vmatprep.subr.bf16.mxu0 %v1912_v44 }
 0x143   :  { %671 = vmatpush1.bf16.msra.mxu0 %v1910_v45  ;;  %v1955_v45 = vld [vmem:[#allocation5 + $0xc0] sm:$0xff]  }
 0x144   :  { %672 = vmatprep.subr.bf16.mxu0 %v1915_v47 }
 0x147   :  { %673 = vmatpush1.bf16.msra.mxu0 %v1913_v48  ;;  %v1956_v48 = vld [vmem:[#allocation5 + $0xc8] sm:$0xff]  }
 0x148   :  { %674 = vmatprep.subr.bf16.mxu0 %v1918_v49  ;;  %v1957_v49 = vld [vmem:[#allocation5 + $0xd0] sm:$0xff]  }
 0x14b   :  { %675 = vmatpush1.bf16.msra.mxu0 %v1916_v50  ;;  %v1958_v50 = vld [vmem:[#allocation5 + $0xd8] sm:$0xff]  }
 0x14c   :  { %676 = vmatprep.subr.bf16.mxu0 %v1921_v51  ;;  %v1959_v51 = vld [vmem:[#allocation5 + $0xe0] sm:$0xff]  }
 0x14f   :  { %677 = vmatpush1.bf16.msra.mxu0 %v1919_v52  ;;  %v1960_v52 = vld [vmem:[#allocation5 + $0xe8] sm:$0xff]  }
 0x150   :  { %678 = vmatprep.subr.bf16.mxu0 %v1924_v55  ;;  %v1961_v55 = vld [vmem:[#allocation5 + $0xf0] sm:$0xff]  }
 0x153   :  { %679 = vmatpush1.bf16.msra.mxu0 %v1922_v57  ;;  %v1962_v57 = vld [vmem:[#allocation5 + $0xf8] sm:$0xff]  }
 0x154   :  { %680 = vmatprep.subr.bf16.mxu0 %v1927_v58  ;;  %v1963_v58 = vld [vmem:[#allocation5 + $0x100] sm:$0xff]  }
 0x157   :  { %681 = vmatpush1.bf16.msra.mxu0 %v1925_v59  ;;  %v1964_v59 = vld [vmem:[#allocation5 + $0x108] sm:$0xff]  }
 0x158   :  { %682 = vmatprep.subr.bf16.mxu0 %v1930_v60  ;;  %v1965_v60 = vld [vmem:[#allocation5 + $0x110] sm:$0xff]  }
 0x15b   :  { %683 = vmatpush1.bf16.msra.mxu0 %v1928_v61  ;;  %v1966_v61 = vld [vmem:[#allocation5 + $0x118] sm:$0xff]  }
 0x15c   :  { %1753 = vmatprep.subr.bf16.mxu0 %v2091_v46 }
 0x15e   :  { %685 = vmatmul.mubr.bf16.vlgmr.msra.gmra.mrb[0].mxu0 %v210_v29  ;;  %v1954_v29 = vld [vmem:[#allocation5 + $0xb8] sm:$0xff]  }
 0x15f   :  { %1769 = vmatprep.mubr.msk.bf16.mxu0 %vm2092_vm2, %v2091_v46  ;;  %1754 = vmatpush3.bf16.msra.mxu0 %v1963_v58 }
 0x160   :  { %1755 = vmatprep.subr.bf16.mxu0 %v2091_v46 }
 0x163   :  { %1756 = vmatpush3.bf16.msra.mxu0 %v1964_v59  ;;  %v1375_v59 = vld [vmem:[#allocation7 + $0x7] ss:$0 sm:$0xff] }
 0x164   :  { %1757 = vmatprep.subr.bf16.mxu0 %v2091_v46 }
 0x167   :  { %1758 = vmatpush3.bf16.msra.mxu0 %v1965_v60 }
 0x168   :  { %1759 = vmatprep.subr.bf16.mxu0 %v2091_v46 }
 0x16b   :  { %1760 = vmatpush3.bf16.msra.mxu0 %v1966_v61 }
 0x16c   :  { %1761 = vmatprep.subr.bf16.mxu0 %v2091_v46 }
 0x16f   :  { %1762 = vmatpush3.bf16.msra.mxu0 %v1967_v62 }
 0x170   :  { %1763 = vmatprep.subr.bf16.mxu0 %v2091_v46 }
 0x173   :  { %1764 = vmatpush3.bf16.msra.mxu0 %v1968_v63 }
 0x174   :  { %1765 = vmatprep.subr.bf16.mxu0 %v2091_v46 }
 0x231   :  { %v686_v3 = vpop.f32.mrb[0].mxu0 }
 0x232   :  { %v1813_v4 = vadd.f32 %v686_v3, %v282_v1  ;;  %v688_v5 = vpop.f32.mrb[1].mxu0 }
 0x233   :  { %v1814_v6 = vadd.f32 %v688_v5, %v286_v2  ;;  %v690_v7 = vpop.f32.mrb[2].mxu0 }
 0x234   :  { %v1815_v8 = vadd.f32 %v690_v7, %v282_v1  ;;  %v692_v9 = vpop.f32.mrb[3].mxu0  ;;  %v695_v11 = vmax.f32 %v1813_v4, 0.0 }
 0x235   :  { %v1816_v10 = vadd.f32 %v692_v9, %v286_v2  ;;  %v696_v13 = vmax.f32 %v1814_v6, 0.0 }
 0x236   :  { %v697_v12 = vmax.f32 %v1815_v8, 0.0 }
 0x237   :  { %v698_v14 = vmax.f32 %v1816_v10, 0.0  ;;  %v1969_v10 = vld [vmem:[#allocation5 + $0x130] sm:$0xff]  }
 0x238   :  { %v699_v15 = vpack.c.bf16 %v697_v12, %v695_v11  ;;  %1766 = vmatpush3.bf16.msra.mxu0 %v1969_v10  ;;  %v1970_v11 = vld [vmem:[#allocation5 + $0x138] sm:$0xff]   ;;  %v1971_v12 = vld [vmem:[#allocation5 + $0x140] sm:$0xff]  }
 0x239   :  { %v716_v17 = vpack.c.bf16 %v698_v14, %v696_v13  ;;  %1767 = vmatprep.subr.bf16.mxu0 %v2091_v46  ;;  %v1972_v13 = vld [vmem:[#allocation5 + $0x148] sm:$0xff]   ;;  %v1973_v14 = vld [vmem:[#allocation5 + $0x150] sm:$0xff]  }
 0x23b   :  { %1690 = vmatmul.mubr.bf16.vlgmr.msra.gmra.mrb[8].mxu1 %v716_v17  ;;  %v1976_v17 = vld [vmem:[#allocation5 + $0x168] sm:$0xff]  }
 0x23c   :  { %1694 = vmatpush3.bf16.msra.mxu1 %v1939_v16  ;;  %1709 = vmatprep.mubr.msk.bf16.mxu1 %vm2092_vm2, %v2091_v46  ;;  %v1975_v16 = vld [vmem:[#allocation5 + $0x160] sm:$0xff]  }
 0x23d   :  { %1695 = vmatprep.subr.bf16.mxu1 %v2091_v46  ;;  %1768 = vmatpush3.bf16.msra.mxu0 %v1970_v11 }
 0x23e   :  { %1793 = vmatprep.subr.bf16.mxu0 %v2091_v46 }
 0x240   :  { %1696 = vmatpush3.bf16.msra.mxu1 %v1940_v54  ;;  %v1045_v54 = vld [vmem:[#allocation7 + $0x4] ss:$0 sm:$0xff] }
 0x241   :  { %1697 = vmatprep.subr.bf16.mxu1 %v2091_v46 }
 0x244   :  { %1698 = vmatpush3.bf16.msra.mxu1 %v1941_v53 }
 0x245   :  { %1699 = vmatprep.subr.bf16.mxu1 %v2091_v46 }
 0x248   :  { %1700 = vmatpush3.bf16.msra.mxu1 %v1942_v56 }
 0x249   :  { %1701 = vmatprep.subr.bf16.mxu1 %v2091_v46 }
 0x24c   :  { %1702 = vmatpush3.bf16.msra.mxu1 %v1943_v18 }
 0x24d   :  { %1703 = vmatprep.subr.bf16.mxu1 %v2091_v46 }
 0x250   :  { %1704 = vmatpush3.bf16.msra.mxu1 %v1944_v19 }
 0x251   :  { %1705 = vmatprep.subr.bf16.mxu1 %v2091_v46 }
 0x254   :  { %1706 = vmatpush3.bf16.msra.mxu1 %v1945_v20 }
 0x255   :  { %1707 = vmatprep.subr.bf16.mxu1 %v2091_v46 }
 0x258   :  { %1708 = vmatpush3.bf16.msra.mxu1 %v1946_v21 }
 0x259   :  { %1713 = vmatprep.subr.bf16.mxu1 %v2091_v46 }
 0x25b   :  { %1710 = vmatmul.mubr.bf16.vlgmr.msra.gmra.mrb[12].mxu1 %v699_v15  ;;  %v1974_v15 = vld [vmem:[#allocation5 + $0x158] sm:$0xff]  }
 0x25c   :  { %1729 = vmatprep.mubr.msk.bf16.mxu1 %vm2092_vm2, %v2091_v46  ;;  %1714 = vmatpush3.bf16.msra.mxu1 %v1947_v22 }
 0x25d   :  { %1715 = vmatprep.subr.bf16.mxu1 %v2091_v46 }
 0x260   :  { %1716 = vmatpush3.bf16.msra.mxu1 %v1948_v23 }
 0x261   :  { %1717 = vmatprep.subr.bf16.mxu1 %v2091_v46 }
 0x264   :  { %1718 = vmatpush3.bf16.msra.mxu1 %v1949_v24 }
 0x265   :  { %1719 = vmatprep.subr.bf16.mxu1 %v2091_v46 }
 0x268   :  { %1720 = vmatpush3.bf16.msra.mxu1 %v1950_v25  ;;  %v1977_v25 = vld [vmem:[#allocation5 + $0x170] sm:$0xff]  }
 0x269   :  { %1721 = vmatprep.subr.bf16.mxu1 %v2091_v46 }
 0x26c   :  { %1722 = vmatpush3.bf16.msra.mxu1 %v1951_v26  ;;  %v1978_v26 = vld [vmem:[#allocation5 + $0x178] sm:$0xff]  }
 0x26d   :  { %1723 = vmatprep.subr.bf16.mxu1 %v2091_v46 }
 0x270   :  { %1724 = vmatpush3.bf16.msra.mxu1 %v1952_v27  ;;  %v1979_v27 = vld [vmem:[#allocation5 + $0x180] sm:$0xff]  }
 0x271   :  { %1725 = vmatprep.subr.bf16.mxu1 %v2091_v46 }
 0x274   :  { %1726 = vmatpush3.bf16.msra.mxu1 %v1953_v28  ;;  %v1980_v28 = vld [vmem:[#allocation5 + $0x188] sm:$0xff]  }
 0x275   :  { %1727 = vmatprep.subr.bf16.mxu1 %v2091_v46 }
 0x278   :  { %1728 = vmatpush3.bf16.msra.mxu1 %v1954_v29  ;;  %v1981_v29 = vld [vmem:[#allocation5 + $0x190] sm:$0xff]  }
 0x279   :  { %1733 = vmatprep.subr.bf16.mxu1 %v2091_v46 }
 0x30e   :  { %v816_v30 = vpop.f32.mrb[8].mxu1 }
 0x30f   :  { %v1691_v31 = vpop.f32.mrb[9].mxu1 }
 0x310   :  { %v819_v32 = vpop.f32.mrb[10].mxu1  ;;  %v1983_v31 = vld [vmem:[#allocation5 + $0x1a0] sm:$0xff]  }
 0x311   :  { %v1692_v33 = vpop.f32.mrb[11].mxu1 }
 0x312   :  { %v1155_v33 = vld [vmem:[#allocation7 + $0x5] ss:$0 sm:$0xff] }
 0x32e   :  { %v905_v34 = vpop.f32.mrb[12].mxu1 }
 0x32f   :  { %v906_v36 = vadd.f32 %v905_v34, %v816_v30  ;;  %v1711_v37 = vpop.f32.mrb[13].mxu1  ;;  %v1982_v30 = vld [vmem:[#allocation5 + $0x198] sm:$0xff]  }
 0x330   :  { %v908_v38 = vpop.f32.mrb[14].mxu1 }
 0x331   :  { %v913_v39 = vadd.f32 %v912_v35, %v906_v36  ;;  %v909_v40 = vadd.f32 %v908_v38, %v819_v32  ;;  %v1712_v41 = vpop.f32.mrb[15].mxu1  ;;  %v1984_v32 = vld [vmem:[#allocation5 + $0x1a8] sm:$0xff]  }
 0x333   :  { %v914_v42 = vadd.f32 %v912_v35, %v909_v40  ;;  %v915_v43 = vmax.f32 %v913_v39, 0.0 }
 0x335   :  { %v916_v44 = vmax.f32 %v914_v42, 0.0 }
 0x337   :  { %v917_v47 = vpack.c.bf16 %v916_v44, %v915_v43  ;;  %v1985_v43 = vld [vmem:[#allocation5 + $0x1b0] sm:$0xff]   ;;  %v1986_v44 = vld [vmem:[#allocation5 + $0x1b8] sm:$0xff]  }
 0x339   :  { %1730 = vmatmul.mubr.bf16.vlgmr.msra.gmra.mrb[16].mxu1 %v917_v47 }
 0x33a   :  { %1734 = vmatpush3.bf16.msra.mxu1 %v1955_v45  ;;  %1749 = vmatprep.mubr.msk.bf16.mxu1 %vm2092_vm2, %v2091_v46  ;;  %v1265_v45 = vld [vmem:[#allocation7 + $0x6] ss:$0 sm:$0xff] }
 0x33b   :  { %1735 = vmatprep.subr.bf16.mxu1 %v2091_v46 }
 0x33e   :  { %1736 = vmatpush3.bf16.msra.mxu1 %v1956_v48 }
 0x33f   :  { %1737 = vmatprep.subr.bf16.mxu1 %v2091_v46 }
 0x342   :  { %1738 = vmatpush3.bf16.msra.mxu1 %v1957_v49 }
 0x343   :  { %1739 = vmatprep.subr.bf16.mxu1 %v2091_v46 }
 0x346   :  { %1740 = vmatpush3.bf16.msra.mxu1 %v1958_v50 }
 0x347   :  { %1741 = vmatprep.subr.bf16.mxu1 %v2091_v46 }
 0x34a   :  { %1742 = vmatpush3.bf16.msra.mxu1 %v1959_v51 }
 0x34b   :  { %1743 = vmatprep.subr.bf16.mxu1 %v2091_v46 }
 0x34e   :  { %1744 = vmatpush3.bf16.msra.mxu1 %v1960_v52 }
 0x34f   :  { %1745 = vmatprep.subr.bf16.mxu1 %v2091_v46 }
 0x352   :  { %1746 = vmatpush3.bf16.msra.mxu1 %v1961_v55 }
 0x353   :  { %1747 = vmatprep.subr.bf16.mxu1 %v2091_v46 }
 0x356   :  { %1748 = vmatpush3.bf16.msra.mxu1 %v1962_v57 }
 0x357   :  { %1773 = vmatprep.subr.bf16.mxu1 %v2091_v46 }
 0x40c   :  { %v1018_v1 = vpop.f32.mrb[16].mxu1 }
 0x40d   :  { %v1019_v2 = vadd.f32 %v1018_v1, %v935_v0  ;;  %v1731_v3 = vpop.f32.mrb[17].mxu1 }
 0x40e   :  { %v1021_v4 = vpop.f32.mrb[18].mxu1 }
 0x40f   :  { %v1022_v5 = vadd.f32 %v1021_v4, %v935_v0  ;;  %v1732_v6 = vpop.f32.mrb[19].mxu1  ;;  %v1025_v7 = vmax.f32 %v1019_v2, 0.0 }
 0x411   :  { %v1026_v8 = vmax.f32 %v1022_v5, 0.0 }
 0x413   :  { %v1027_v9 = vpack.c.bf16 %v1026_v8, %v1025_v7 }
 0x415   :  { %1750 = vmatmul.mubr.bf16.vlgmr.msra.gmra.mrb[20].mxu1 %v1027_v9 }
 0x416   :  { %1789 = vmatprep.mubr.msk.bf16.mxu1 %vm2092_vm2, %v2091_v46  ;;  %1774 = vmatpush3.bf16.msra.mxu1 %v1971_v12 }
 0x417   :  { %1775 = vmatprep.subr.bf16.mxu1 %v2091_v46 }
 0x41a   :  { %1776 = vmatpush3.bf16.msra.mxu1 %v1972_v13 }
 0x41b   :  { %1777 = vmatprep.subr.bf16.mxu1 %v2091_v46 }
 0x41e   :  { %1778 = vmatpush3.bf16.msra.mxu1 %v1973_v14 }
 0x41f   :  { %1779 = vmatprep.subr.bf16.mxu1 %v2091_v46 }
 0x422   :  { %1780 = vmatpush3.bf16.msra.mxu1 %v1974_v15 }
 0x423   :  { %1781 = vmatprep.subr.bf16.mxu1 %v2091_v46 }
 0x426   :  { %1782 = vmatpush3.bf16.msra.mxu1 %v1975_v16 }
 0x427   :  { %1783 = vmatprep.subr.bf16.mxu1 %v2091_v46 }
 0x42a   :  { %1784 = vmatpush3.bf16.msra.mxu1 %v1976_v17 }
 0x42b   :  { %1785 = vmatprep.subr.bf16.mxu1 %v2091_v46 }
 0x42e   :  { %1786 = vmatpush3.bf16.msra.mxu1 %v1977_v25 }
 0x42f   :  { %1787 = vmatprep.subr.bf16.mxu1 %v2091_v46 }
 0x432   :  { %1788 = vmatpush3.bf16.msra.mxu1 %v1978_v26 }
 0x4e8   :  { %v1128_v53 = vpop.f32.mrb[20].mxu1 }
 0x4e9   :  { %v1129_v56 = vadd.f32 %v1128_v53, %v1045_v54  ;;  %v1751_v18 = vpop.f32.mrb[21].mxu1 }
 0x4ea   :  { %v1131_v19 = vpop.f32.mrb[22].mxu1 }
 0x4eb   :  { %v1132_v20 = vadd.f32 %v1131_v19, %v1045_v54  ;;  %v1752_v21 = vpop.f32.mrb[23].mxu1  ;;  %v1135_v22 = vmax.f32 %v1129_v56, 0.0 }
 0x4ed   :  { %v1136_v23 = vmax.f32 %v1132_v20, 0.0 }
 0x4ef   :  { %v1137_v24 = vpack.c.bf16 %v1136_v23, %v1135_v22 }
 0x4f1   :  { %1770 = vmatmul.mubr.bf16.vlgmr.msra.gmra.mrb[4].mxu0 %v1137_v24 }
 0x4f2   :  { %1809 = vmatprep.mubr.msk.bf16.mxu0 %vm2092_vm2, %v2091_v46  ;;  %1794 = vmatpush3.bf16.msra.mxu0 %v1979_v27 }
 0x4f3   :  { %1795 = vmatprep.subr.bf16.mxu0 %v2091_v46 }
 0x4f6   :  { %1796 = vmatpush3.bf16.msra.mxu0 %v1980_v28 }
 0x4f7   :  { %1797 = vmatprep.subr.bf16.mxu0 %v2091_v46 }
 0x4fa   :  { %1798 = vmatpush3.bf16.msra.mxu0 %v1981_v29 }
 0x4fb   :  { %1799 = vmatprep.subr.bf16.mxu0 %v2091_v46 }
 0x4fe   :  { %1800 = vmatpush3.bf16.msra.mxu0 %v1982_v30 }
 0x4ff   :  { %1801 = vmatprep.subr.bf16.mxu0 %v2091_v46 }
 0x502   :  { %1802 = vmatpush3.bf16.msra.mxu0 %v1983_v31 }
 0x503   :  { %1803 = vmatprep.subr.bf16.mxu0 %v2091_v46 }
 0x506   :  { %1804 = vmatpush3.bf16.msra.mxu0 %v1984_v32 }
 0x507   :  { %1805 = vmatprep.subr.bf16.mxu0 %v2091_v46 }
 0x50a   :  { %1806 = vmatpush3.bf16.msra.mxu0 %v1985_v43 }
 0x50b   :  { %1807 = vmatprep.subr.bf16.mxu0 %v2091_v46 }
 0x50e   :  { %1808 = vmatpush3.bf16.msra.mxu0 %v1986_v44 }
 0x5c4   :  { %v1238_v34 = vpop.f32.mrb[4].mxu0 }
 0x5c5   :  { %v1239_v35 = vadd.f32 %v1238_v34, %v1155_v33  ;;  %v1771_v36 = vpop.f32.mrb[5].mxu0 }
 0x5c6   :  { %v1241_v37 = vpop.f32.mrb[6].mxu0 }
 0x5c7   :  { %v1242_v38 = vadd.f32 %v1241_v37, %v1155_v33  ;;  %v1772_v39 = vpop.f32.mrb[7].mxu0  ;;  %v1245_v40 = vmax.f32 %v1239_v35, 0.0 }
 0x5c9   :  { %v1246_v41 = vmax.f32 %v1242_v38, 0.0 }
 0x5cb   :  { %v1247_v42 = vpack.c.bf16 %v1246_v41, %v1245_v40 }
 0x5cd   :  { %1790 = vmatmul.mubr.bf16.vlgmr.msra.gmra.mrb[24].mxu1 %v1247_v42 }
 0x6a0   :  { %v1348_v47 = vpop.f32.mrb[24].mxu1 }
 0x6a1   :  { %v1349_v48 = vadd.f32 %v1348_v47, %v1265_v45  ;;  %v1791_v49 = vpop.f32.mrb[25].mxu1 }
 0x6a2   :  { %v1351_v50 = vpop.f32.mrb[26].mxu1 }
 0x6a3   :  { %v1352_v51 = vadd.f32 %v1351_v50, %v1265_v45  ;;  %v1792_v52 = vpop.f32.mrb[27].mxu1  ;;  %v1355_v55 = vmax.f32 %v1349_v48, 0.0 }
 0x6a5   :  { %v1356_v57 = vmax.f32 %v1352_v51, 0.0 }
 0x6a7   :  { %v1357_v58 = vpack.c.bf16 %v1356_v57, %v1355_v55 }
 0x6a9   :  { %1810 = vmatmul.mubr.bf16.vlgmr.msra.gmra.mrb[8].mxu0 %v1357_v58 }
 0x77c   :  { %v1458_v60 = vpop.f32.mrb[8].mxu0 }
 0x77d   :  { %v1459_v61 = vadd.f32 %v1458_v60, %v1375_v59  ;;  %v1811_v62 = vpop.f32.mrb[9].mxu0 }
 0x77e   :  { %v1461_v46 = vpop.f32.mrb[10].mxu0 }
 0x77f   :  { %1465 = vst [vmem:[#allocation8] sm:$0xff] %v1459_v61  ;;  %v1462_v63 = vadd.f32 %v1461_v46, %v1375_v59  ;;  %v1812_v0 = vpop.f32.mrb[11].mxu0 }
 0x781   :  { %1466 = vst [vmem:[#allocation8 + $0x8] sm:$0xff] %v1462_v63 }
 0x782   :  { %2064 = shalt.err (!%p2061_p0)
}
 0x783   :  { %s2065_s8 = scalar_lea.hbm %s2270_s4, 256 }
 0x784   :  { %p2066_p1 = scmp.ne.s32.totalorder %s2270_s4, %s2065_s8  ;;  %p2069_p2 = scmp.lt.u32.totalorder %s2065_s8, %s2270_s4 }
 0x786   :  { %p2071_p3 = pnand %p2069_p2, %p2066_p1 }
 0x788   :  { %2074 = shalt.err (!%p2071_p3)
}
 0x789   :  { %1478 = dma.vmem_to_hbm [thread:$0]  %s1473_s3, 256, %s2270_s4, [#allocation4], %s2085_s2, %s2085_s2, %s2086_s13  }
 0x78a   :  { %2079 = dma.done.wait [#allocation4], 256  }
 0x78b   :  { %2080 = vsyncadd [#allocation4], 4294967040 }
 0x78c   :  { %1482 = vsyncpa [#allocation3], 1 }
 0x78d   :  { %1483 = vsyncpa [#allocation6], 1 }
 0x78e   :  { %1484 = vsyncpa [#allocation4], 1 }

</bundles_post_ra>
